<compile_context>
chip_gen: v7x
topology: tpu7x:2x2x1
jax: 0.10.0
libtpu: 0.0.40
codegen_flags: <defaults>
</compile_context>

<pallas_src>
import functools

import jax
import jax.numpy as jnp
from jax.experimental import pallas as pl
from jax.experimental.pallas import tpu as pltpu

LANES = 128
SUBLANES = 8          # f32 sublane tile; the accumulator is always (8,128) f32
CHUNK_ROWS = 512      # in-kernel streaming chunk (multiple of 32 -> any dtype)


def _mae_kernel(c_ref, e_ref, o_ref, acc_ref, *,
                rows, tile_rows, chunk, steps_per_core):
    """Accumulate sum(|clean - est|) of one row tile into an (8,128) f32 slab."""
    c = pl.program_id(0)   # per-TensorCore ("parallel") axis
    i = pl.program_id(1)   # reduction ("arbitrary") axis: tiles owned by core c

    @pl.when(i == 0)
    def _():
        acc_ref[...] = jnp.zeros_like(acc_ref)

    # Logical (unclamped) tile id.  Padded / clamped-duplicate grid steps get
    # valid_rows <= 0 and therefore contribute exactly zero.
    gtile = c * steps_per_core + i
    valid_rows = rows - gtile * tile_rows

    # TPU rejects 1-D iota; hoist the 2-D broadcasted iota out of the loop.
    row_ids = jax.lax.broadcasted_iota(jnp.int32, (chunk, LANES), 0)
    n_chunks = tile_rows // chunk

    def chunk_body(j, carry):
        off = pl.multiple_of(j * chunk, chunk)
        d = jnp.abs(c_ref[pl.ds(off, chunk), :]
                    - e_ref[pl.ds(off, chunk), :]).astype(jnp.float32)
        # Rows of this chunk still inside the logical array.  where() is a
        # select, so garbage rows (clipped tail-tile DMA) never enter the sum.
        v = valid_rows - j * chunk
        d = jnp.where(row_ids < v, d, 0.0)
        # Fold into the lane-dense (8,128) accumulator: pure VALU adds.
        acc_ref[...] += jnp.sum(
            d.reshape(chunk // SUBLANES, SUBLANES, LANES), axis=0)
        return carry

    jax.lax.fori_loop(0, n_chunks, chunk_body, 0, unroll=(n_chunks <= 8))

    @pl.when(i == pl.num_programs(1) - 1)
    def _():
        o_ref[0] = acc_ref[...]


def _device_kind():
    try:
        return jax.devices()[0].device_kind.lower()
    except Exception:
        return ""


def pase_loss(clean, est):
    """Mean absolute error computed in a Pallas TPU kernel (== PASELoss.forward)."""
    assert clean.shape == est.shape, "clean/est shape mismatch"
    n_elems = int(clean.size)
    assert n_elems > 0, "empty input"

    dtype = jnp.result_type(clean.dtype, est.dtype)
    clean = clean.astype(dtype)
    est = est.astype(dtype)
    itemsize = jnp.dtype(dtype).itemsize
    pack = max(1, 4 // itemsize)          # sublane packing factor (1 / 2 / 4)
    sub = SUBLANES * pack                 # min legal row tile: 8 / 16 / 32
    elem_align = sub * LANES

    c_flat = jnp.ravel(clean)
    e_flat = jnp.ravel(est)
    if n_elems % elem_align:
        # TODO(synk): misaligned sizes pay one HBM copy of both inputs here; an
        # in-kernel lane mask on a 1-D block view would avoid it.
        pad = elem_align - n_elems % elem_align
        c_flat = jnp.pad(c_flat, (0, pad))
        e_flat = jnp.pad(e_flat, (0, pad))

    rows = c_flat.size // LANES           # always a multiple of `sub` (>= 8)
    c2d = c_flat.reshape(rows, LANES)
    e2d = e_flat.reshape(rows, LANES)

    # ---- generation-aware sizing -------------------------------------------
    kind = _device_kind()
    is_v7 = ("v7" in kind) or ("7x" in kind)
    big_vmem = (not is_v7) and any(g in kind for g in ("v4", "v5", "v6"))
    num_cores = 2 if is_v7 else 1                    # 2 TensorCores only on v7x
    base_rows = 16384 if big_vmem else 8192          # f32 rows per input block
    max_tile_rows = base_rows * pack                 # keep bytes/block constant
    vmem_limit = (64 if big_vmem else 32) * 1024 * 1024

    if rows <= CHUNK_ROWS:
        tile_rows = rows                  # single tile covering the full array
        chunk = rows
    else:
        tile_rows = min(max_tile_rows, (rows // CHUNK_ROWS) * CHUNK_ROWS)
        chunk = CHUNK_ROWS

    num_tiles = pl.cdiv(rows, tile_rows)

    if num_cores > 1:
        if num_tiles < num_cores:
            num_cores = 1                 # not enough tiles to split across TCs
        elif num_tiles % num_cores:
            # Shave tile_rows so the tile count is a multiple of the core count,
            # avoiding a clamped-duplicate HBM re-read on v7x.
            target = ((num_tiles + num_cores - 1) // num_cores) * num_cores
            new_tile = (((rows + target - 1) // target + CHUNK_ROWS - 1)
                        // CHUNK_ROWS) * CHUNK_ROWS
            new_tile = max(CHUNK_ROWS, min(new_tile, tile_rows))
            if pl.cdiv(rows, new_tile) % num_cores == 0:
                tile_rows = new_tile
                num_tiles = pl.cdiv(rows, tile_rows)
            # else: fall back to the masked clamped-duplicate path (correct).

    steps_per_core = pl.cdiv(num_tiles, num_cores)

    kernel = functools.partial(
        _mae_kernel, rows=rows, tile_rows=tile_rows, chunk=chunk,
        steps_per_core=steps_per_core)

    def in_map(c, i):
        # Clamp so padded grid steps re-point at the last tile; their
        # contribution is masked to zero inside the kernel.
        return (jnp.minimum(c * steps_per_core + i, num_tiles - 1), 0)

    out = pl.pallas_call(
        kernel,
        out_shape=jax.ShapeDtypeStruct((num_cores, SUBLANES, LANES), jnp.float32),
        grid_spec=pltpu.PrefetchScalarGridSpec(
            num_scalar_prefetch=0,
            grid=(num_cores, steps_per_core),
            in_specs=[
                pl.BlockSpec((tile_rows, LANES), in_map),
                pl.BlockSpec((tile_rows, LANES), in_map),
            ],
            out_specs=pl.BlockSpec((1, SUBLANES, LANES), lambda c, i: (c, 0, 0)),
            scratch_shapes=[pltpu.VMEM((SUBLANES, LANES), jnp.float32)],
        ),
        compiler_params=pltpu.CompilerParams(
            dimension_semantics=("parallel", "arbitrary"),
            vmem_limit_bytes=vmem_limit,
        ),
    )(c2d, e2d)

    # Single cross-lane reduce + normalization, hoisted out of the kernel.
    return jnp.sum(out) / jnp.float32(n_elems)


if __name__ == "__main__":
    key = jax.random.PRNGKey(0)
    k1, k2 = jax.random.split(key)

    # Small NCHW-style inputs, as PASELoss would see (batch, chan, H, W).
    shape = (2, 4, 16, 16)
    clean = jax.random.normal(k1, shape, dtype=jnp.float32)
    est = jax.random.normal(k2, shape, dtype=jnp.float32)

    loss = pase_loss(clean, est)
    jax.block_until_ready(loss)

    # Sanity check against the plain-JAX reference (== torch.mean(torch.abs)).
    ref = jnp.mean(jnp.abs(clean - est))
    assert jnp.allclose(loss, ref, rtol=1e-5, atol=1e-6), (loss, ref)

    print("KERNEL_OK")
</pallas_src>

<mosaic_0001>
module attributes {stable_mosaic.version = 11 : i64} {
  func.func @_mae_kernel(%arg0: i32, %arg1: i32, %arg2: memref<16x128xf32, #tpu.memory_space<vmem>>, %arg3: memref<16x128xf32, #tpu.memory_space<vmem>>, %arg4: memref<1x8x128xf32, #tpu.memory_space<vmem>>, %arg5: memref<8x128xf32, #tpu.memory_space<vmem>>) attributes {dimension_semantics = [#tpu.dimension_semantics<parallel>, #tpu.dimension_semantics<arbitrary>], iteration_bounds = array<i64: 1, 1>, scalar_prefetch = 0 : i64, scratch_operands = 1 : i64, tpu.core_type = #tpu.core_type<tc>, window_params = [{transform_indices = @transform_0, window_bounds = array<i64: 16, 128>}, {transform_indices = @transform_1, window_bounds = array<i64: 16, 128>}, {transform_indices = @transform_2, window_bounds = array<i64: 1, 8, 128>}]} {
    %c0_i32 = arith.constant 0 : i32
    %0 = arith.cmpi eq, %arg1, %c0_i32 : i32
    %1 = arith.extui %0 : i1 to i32
    %c0_i32_0 = arith.constant 0 : i32
    %2 = arith.cmpi ne, %1, %c0_i32_0 : i32
    scf.if %2 {
      %cst_14 = arith.constant 0.000000e+00 : f32
      %30 = vector.broadcast %cst_14 : f32 to vector<8x128xf32>
      %c0_15 = arith.constant 0 : index
      %c0_16 = arith.constant 0 : index
      %31 = vector.load %arg5[%c0_15, %c0_16] : memref<8x128xf32, #tpu.memory_space<vmem>>, vector<8x128xf32>
      tpu.vector_store %arg5[%c0_15, %c0_16], %30 {strides = array<i32>} : memref<8x128xf32, #tpu.memory_space<vmem>>, vector<8x128xf32>,
    } else {
    }
    %c1_i32 = arith.constant 1 : i32
    %3 = arith.muli %arg0, %c1_i32 : i32
    %4 = arith.addi %3, %arg1 : i32
    %c16_i32 = arith.constant 16 : i32
    %5 = arith.muli %4, %c16_i32 : i32
    %c16_i32_1 = arith.constant 16 : i32
    %6 = arith.subi %c16_i32_1, %5 : i32
    %7 = tpu.iota {dimensions = array<i32: 0>} : vector<16x128xi32>
    %c0_i32_2 = arith.constant 0 : i32
    %c16_i32_3 = arith.constant 16 : i32
    %8 = arith.muli %c0_i32_2, %c16_i32_3 : i32
    %9 = tpu.assume_multiple %8, 16 : i32
    %10 = arith.index_cast %9 : i32 to index
    %c0 = arith.constant 0 : index
    %11 = vector.load %arg2[%10, %c0] : memref<16x128xf32, #tpu.memory_space<vmem>>, vector<16x128xf32>
    %12 = arith.index_cast %9 : i32 to index
    %c0_4 = arith.constant 0 : index
    %13 = vector.load %arg3[%12, %c0_4] : memref<16x128xf32, #tpu.memory_space<vmem>>, vector<16x128xf32>
    %14 = arith.subf %11, %13 : vector<16x128xf32>
    %15 = math.absf %14 : vector<16x128xf32>
    %c16_i32_5 = arith.constant 16 : i32
    %16 = arith.muli %c0_i32_2, %c16_i32_5 : i32
    %17 = arith.subi %6, %16 : i32
    %18 = vector.broadcast %17 : i32 to vector<16x128xi32>
    %19 = arith.cmpi slt, %7, %18 : vector<16x128xi32>
    %cst = arith.constant 0.000000e+00 : f32
    %20 = vector.broadcast %cst : f32 to vector<16x128xf32>
    %21 = arith.select %19, %15, %20 : vector<16x128xi1>, vector<16x128xf32>
    %c0_6 = arith.constant 0 : index
    %c0_7 = arith.constant 0 : index
    %22 = vector.load %arg5[%c0_6, %c0_7] : memref<8x128xf32, #tpu.memory_space<vmem>>, vector<8x128xf32>
    %23 = vector.shape_cast %21 : vector<16x128xf32> to vector<2x8x128xf32>
    %cst_8 = arith.constant dense<0.000000e+00> : vector<8x128xf32>
    %24 = vector.multi_reduction <add>, %23, %cst_8 [0] : vector<2x8x128xf32> to vector<8x128xf32>
    %25 = arith.addf %22, %24 : vector<8x128xf32>
    %c0_9 = arith.constant 0 : index
    %c0_10 = arith.constant 0 : index
    %26 = vector.load %arg5[%c0_9, %c0_10] : memref<8x128xf32, #tpu.memory_space<vmem>>, vector<8x128xf32>
    tpu.vector_store %arg5[%c0_9, %c0_10], %25 {strides = array<i32>} : memref<8x128xf32, #tpu.memory_space<vmem>>, vector<8x128xf32>,
    %c1_i32_11 = arith.constant 1 : i32
    %c0_i32_12 = arith.constant 0 : i32
    %27 = arith.cmpi eq, %arg1, %c0_i32_12 : i32
    %28 = arith.extui %27 : i1 to i32
    %c0_i32_13 = arith.constant 0 : i32
    %29 = arith.cmpi ne, %28, %c0_i32_13 : i32
    scf.if %29 {
      %c0_14 = arith.constant 0 : index
      %c0_15 = arith.constant 0 : index
      %30 = vector.load %arg5[%c0_14, %c0_15] : memref<8x128xf32, #tpu.memory_space<vmem>>, vector<8x128xf32>
      %c0_16 = arith.constant 0 : index
      %c0_17 = arith.constant 0 : index
      %c0_18 = arith.constant 0 : index
      %31 = vector.load %arg4[%c0_16, %c0_17, %c0_18] : memref<1x8x128xf32, #tpu.memory_space<vmem>>, vector<1x8x128xf32>
      %32 = vector.shape_cast %31 : vector<1x8x128xf32> to vector<8x128xf32>
      %33 = vector.shape_cast %30 : vector<8x128xf32> to vector<1x8x128xf32>
      tpu.vector_store %arg4[%c0_16, %c0_17, %c0_18], %33 {strides = array<i32>} : memref<1x8x128xf32, #tpu.memory_space<vmem>>, vector<1x8x128xf32>,
    } else {
    }
    return
  }
  func.func @transform_0(%arg0: i32, %arg1: i32) -> (i32, i32) {
    %c1_i32 = arith.constant 1 : i32
    %0 = arith.muli %arg0, %c1_i32 : i32
    %1 = arith.addi %0, %arg1 : i32
    %c0_i32 = arith.constant 0 : i32
    %2 = arith.minsi %1, %c0_i32 : i32
    %c0_i32_0 = arith.constant 0 : i32
    %c0_i32_1 = arith.constant 0 : i32
    return %2, %c0_i32_0 : i32, i32
  }
  func.func @transform_1(%arg0: i32, %arg1: i32) -> (i32, i32) {
    %c1_i32 = arith.constant 1 : i32
    %0 = arith.muli %arg0, %c1_i32 : i32
    %1 = arith.addi %0, %arg1 : i32
    %c0_i32 = arith.constant 0 : i32
    %2 = arith.minsi %1, %c0_i32 : i32
    %c0_i32_0 = arith.constant 0 : i32
    %c0_i32_1 = arith.constant 0 : i32
    return %2, %c0_i32_0 : i32, i32
  }
  func.func @transform_2(%arg0: i32, %arg1: i32) -> (i32, i32, i32) {
    %c0_i32 = arith.constant 0 : i32
    %c0_i32_0 = arith.constant 0 : i32
    %c0_i32_1 = arith.constant 0 : i32
    return %arg0, %c0_i32, %c0_i32_0 : i32, i32, i32
  }
}

</mosaic_0001>

<bundles_post_ra>
// kernel: tpu_custom_call.1
= control target key start
LH: loop header
LB: loop body
LE: loop exit
PB: predicated region body
PF: predicated region fallthrough
CT: control target
= control target key end

     0   :  { %7 = vsyncpa [#allocation4], 0  ;;  %s246_s0 = inlined_call_operand.hbm [shape: f32[16,128], index: 0, kind: input, shape index: {}]   ;;  %s247_s1 = inlined_call_operand.hbm [shape: f32[16,128], index: 1, kind: input, shape index: {}]   ;;  %s248_s2 = inlined_call_operand.hbm [shape: f32[1,8,128], index: 2, kind: output, shape index: {}]  }
   0x1   :  { %8 = vsyncpa [#allocation7], 0 }
   0x2   :  { %9 = vsyncpa [#allocation5], 0  ;;  %s190_s9 = smov [#allocation3]   ;;  %s118_s13 = scalar_lea.hbm %s246_s0, 256 }
   0x3   :  { %s21_s10 = sshll.u32 %s190_s9, 4  ;;  %p119_p0 = scmp.ne.s32.totalorder %s246_s0, %s118_s13  ;;  %s22_s10 = int_to_ptr.vmem [resolvable:$true] %s21_s10 }
   0x4   :  { %p122_p1 = scmp.lt.u32.totalorder %s118_s13, %s246_s0 }
   0x6   :  { %p124_p2 = pnand %p122_p1, %p119_p0 }
   0x8   :  { %127 = shalt.err (!%p124_p2)
}
   0x9   :  { %s128_s18 = scalar_lea.vmem %s22_s10, 256  ;;  %p133_p4 = scmp.lt.s32.totalorder %s22_s10, %s22_s10 }
   0xa   :  { %p129_p3 = scmp.ne.s32.totalorder %s22_s10, %s128_s18  ;;  %p134_p5 = scmp.lt.s32.totalorder %s128_s18, %s128_s18 }
   0xc   :  { %p135_p6 = por %p134_p5, %p133_p4 }
   0xe   :  { %p136_p7 = pnand %p135_p6, %p129_p3 }
  0x10   :  { %139 = shalt.err (!%p136_p7)
}
  0x11   :  { %s191_s19 = smov 128   ;;  %s192_s20 = smov 8  }
  0x12   :  { %27 = dma.hbm_to_vmem [thread:$0]  %s246_s0, 256, %s22_s10, [#allocation4], %s191_s19, %s191_s19, %s192_s20  }
  0x13   :  { %s193_s23 = smov [#allocation6]   ;;  %s140_s27 = scalar_lea.hbm %s247_s1, 256 }
  0x14   :  { %s39_s24 = sshll.u32 %s193_s23, 4  ;;  %p141_p8 = scmp.ne.s32.totalorder %s247_s1, %s140_s27  ;;  %s40_s24 = int_to_ptr.vmem [resolvable:$true] %s39_s24 }
  0x15   :  { %p144_p9 = scmp.lt.u32.totalorder %s140_s27, %s247_s1 }
  0x17   :  { %p146_p10 = pnand %p144_p9, %p141_p8 }
  0x19   :  { %149 = shalt.err (!%p146_p10)
}
  0x1a   :  { %s150_s4 = scalar_lea.vmem %s40_s24, 256  ;;  %p155_p12 = scmp.lt.s32.totalorder %s40_s24, %s40_s24 }
  0x1b   :  { %p151_p11 = scmp.ne.s32.totalorder %s40_s24, %s150_s4  ;;  %p156_p13 = scmp.lt.s32.totalorder %s150_s4, %s150_s4 }
  0x1d   :  { %p157_p0 = por %p156_p13, %p155_p12 }
  0x1f   :  { %p158_p1 = pnand %p157_p0, %p151_p11 }
  0x21   :  { %161 = shalt.err (!%p158_p1)
}
  0x22   :  { %45 = dma.hbm_to_vmem [thread:$0]  %s247_s1, 256, %s40_s24, [#allocation7], %s191_s19, %s191_s19, %s192_s20  }
  0x23   :  { %184 = dma.done.wait [#allocation4], 256  }
  0x24   :  { %185 = vsyncadd [#allocation4], 4294967040 }
  0x25   :  { %186 = dma.done.wait [#allocation7], 256  }
  0x26   :  { %187 = vsyncadd [#allocation7], 4294967040  ;;  %v71_v0 = vld [vmem:[#allocation3] sm:$0xff]  ;;  %v72_v1 = vld [vmem:[#allocation3 + $0x8] sm:$0xff]  ;;  %s194_s6 = smov [#allocation8]  }
  0x27   :  { %v73_v2 = vld [vmem:[#allocation6] sm:$0xff]  ;;  %v74_v3 = vld [vmem:[#allocation6 + $0x8] sm:$0xff]  ;;  %s99_s7 = sshll.u32 %s194_s6, 4  ;;  %s100_s7 = int_to_ptr.vmem [resolvable:$true] %s99_s7 }
  0x28   :  { %v75_v4 = vsub.f32 %v71_v0, %v73_v2  ;;  %v76_v5 = vsub.f32 %v72_v1, %v74_v3  ;;  %s162_s8 = scalar_lea.vmem %s100_s7, 128  ;;  %p167_p3 = scmp.lt.s32.totalorder %s100_s7, %s100_s7 }
  0x29   :  { %p163_p2 = scmp.ne.s32.totalorder %s100_s7, %s162_s8  ;;  %p168_p4 = scmp.lt.s32.totalorder %s162_s8, %s162_s8 }
  0x2a   :  { %v77_v6 = vand.u32 2147483647, %v75_v4  ;;  %v78_v7 = vand.u32 2147483647, %v76_v5 }
  0x2b   :  { %p169_p5 = por %p168_p4, %p167_p3 }
  0x2c   :  { %v85_v8 = vadd.f32 %v78_v7, %v77_v6 }
  0x2d   :  { %p170_p6 = pnand %p169_p5, %p163_p2 }
  0x2e   :  { %92 = vst [vmem:[#allocation8] sm:$0xff] %v85_v8 }
  0x2f   :  { %173 = shalt.err (!%p170_p6)
}
  0x30   :  { %s174_s10 = scalar_lea.hbm %s248_s2, 128 }
  0x31   :  { %p175_p7 = scmp.ne.s32.totalorder %s248_s2, %s174_s10  ;;  %p178_p8 = scmp.lt.u32.totalorder %s174_s10, %s248_s2 }
  0x33   :  { %p180_p9 = pnand %p178_p8, %p175_p7 }
  0x35   :  { %183 = shalt.err (!%p180_p9)
}
  0x36   :  { %102 = dma.vmem_to_hbm [thread:$0]  %s100_s7, 128, %s248_s2, [#allocation5]  }
  0x37   :  { %188 = dma.done.wait [#allocation5], 128  }
  0x38   :  { %189 = vsyncadd [#allocation5], 4294967168 }
  0x39   :  { %106 = vsyncpa [#allocation4], 1 }
  0x3a   :  { %107 = vsyncpa [#allocation7], 1 }
  0x3b   :  { %108 = vsyncpa [#allocation5], 1 }

</bundles_post_ra>
